<compile_context>
chip_gen: v5e
topology: v5e:2x2
jax: 0.10.0
libtpu: 0.0.40
codegen_flags: <defaults>
</compile_context>

<pallas_src>
import functools

import jax
import jax.numpy as jnp
from jax.experimental import pallas as pl
from jax.experimental.pallas import tpu as pltpu


# ----------------------------------------------------------------------------
# Pallas kernel: fused  out_T = relu?( W @ X_T + b )   (bf16 MXU, f32 accum)
# ----------------------------------------------------------------------------
def _matmul_t_kernel(w_ref, x_ref, b_ref, o_ref, *, relu):
    # w: (OC, K) bf16, x: (K, TM) bf16, b: (OC, 1) f32  ->  o: (OC, TM) f32
    acc = jnp.dot(w_ref[...], x_ref[...], preferred_element_type=jnp.float32)
    acc = acc + b_ref[...]          # (OC, 1) broadcasts across lanes
    if relu:
        acc = jnp.maximum(acc, 0.0)
    o_ref[...] = acc.astype(o_ref.dtype)


def pallas_matmul_t_bias(w, x_t, b_col, *, relu, tm=1024):
    """Computes relu?(w @ x_t + b_col) with an M-tiled grid.

    w:     (OC, K)    (cast to bf16)
    x_t:   (K,  M)    (cast to bf16)
    b_col: (OC, 1)    f32
    returns (OC, M)   f32
    """
    OC, K = w.shape
    K2, M = x_t.shape
    assert K == K2, (K, K2)

    w = w.astype(jnp.bfloat16)
    x_t = x_t.astype(jnp.bfloat16)
    b_col = b_col.astype(jnp.float32)

    # Tile M (the lane axis of the output). Small M -> single full-extent block
    # (allowed even when not a multiple of 128); large M -> pad to a multiple
    # of TM and tile, so VMEM usage is independent of the problem size.
    if M <= tm:
        tm_eff, m_pad = M, M
    else:
        tm_eff = tm
        m_pad = ((M + tm - 1) // tm) * tm
        if m_pad != M:
            x_t = jnp.pad(x_t, ((0, 0), (0, m_pad - M)))
    grid = (m_pad // tm_eff,)

    out = pl.pallas_call(
        functools.partial(_matmul_t_kernel, relu=relu),
        out_shape=jax.ShapeDtypeStruct((OC, m_pad), jnp.float32),
        grid=grid,
        in_specs=[
            pl.BlockSpec((OC, K), lambda i: (0, 0)),        # weights, resident
            pl.BlockSpec((K, tm_eff), lambda i: (0, i)),    # cols tile (pipelined)
            pl.BlockSpec((OC, 1), lambda i: (0, 0)),        # bias column
        ],
        out_specs=pl.BlockSpec((OC, tm_eff), lambda i: (0, i)),
        compiler_params=pltpu.CompilerParams(
            dimension_semantics=("parallel",),              # megacore-shardable
            vmem_limit_bytes=48 * 1024 * 1024,              # safe on v7x (64 MiB)
        ),
    )(w, x_t, b_col)

    if m_pad != M:
        out = out[:, :M]
    return out


# ----------------------------------------------------------------------------
# im2col in (C, N, H, W) layout, producing cols_T of shape (C*KH*KW, N*OH*OW)
# with the K axis ordered (C, KH, KW) to match torch's (OC, C, KH, KW) weights.
# ----------------------------------------------------------------------------
def _im2col_t(x_cnhw, kh_size, kw_size, stride):
    C, N, H, W = x_cnhw.shape
    OH = (H - kh_size) // stride + 1
    OW = (W - kw_size) // stride + 1
    patches = []
    for kh in range(kh_size):
        for kw in range(kw_size):
            patches.append(
                x_cnhw[:, :, kh:kh + stride * OH:stride, kw:kw + stride * OW:stride]
            )
    p = jnp.stack(patches, axis=0).reshape(kh_size, kw_size, C, N, OH, OW)
    p = jnp.transpose(p, (2, 0, 1, 3, 4, 5))           # (C, KH, KW, N, OH, OW)
    cols_t = p.reshape(C * kh_size * kw_size, N * OH * OW)
    return cols_t, OH, OW


def conv2d_pallas(x_cnhw, wmat, b_col, kh, kw, stride, *, relu=True):
    """x_cnhw: (C, N, H, W); wmat: (OC, C*KH*KW); b_col: (OC, 1).

    Returns the conv output in (OC, N, OH, OW) layout (ready for next layer).
    """
    _, N, _, _ = x_cnhw.shape
    OC = wmat.shape[0]
    cols_t, OH, OW = _im2col_t(x_cnhw, kh, kw, stride)
    out_t = pallas_matmul_t_bias(wmat, cols_t, b_col, relu=relu)   # (OC, N*OH*OW)
    return out_t.reshape(OC, N, OH, OW)


# ----------------------------------------------------------------------------
# Target_RND forward
# ----------------------------------------------------------------------------
def target_rnd_forward(x_nchw, params):
    # NCHW -> CNHW once; conv layers then chain with no layout transposes.
    x = jnp.transpose(x_nchw, (1, 0, 2, 3))
    x = conv2d_pallas(x, params["w1m"], params["b1"], 8, 8, 4, relu=True)
    x = conv2d_pallas(x, params["w2m"], params["b2"], 4, 4, 2, relu=True)
    x = conv2d_pallas(x, params["w3m"], params["b3"], 3, 3, 1, relu=True)

    # torch: x.view(N, -1) on the NCHW tensor => flatten in (C, H, W) order.
    OC, N, OH, OW = x.shape
    flat_t = jnp.transpose(x, (0, 2, 3, 1)).reshape(OC * OH * OW, N)   # (feat, N)

    # fc: Linear(feat -> rnd_rep_size); wfc is (rep, feat) so no transpose needed.
    out_t = pallas_matmul_t_bias(params["wfc"], flat_t, params["bfc"], relu=False)
    return out_t.T                                                     # (N, rep)


# ----------------------------------------------------------------------------
# Parameters
# ----------------------------------------------------------------------------
def init_params_torch_layout(key, in_ch, h, w, rnd_rep_size):
    """Random parameters in the exact shapes PyTorch's Target_RND holds."""
    ks = jax.random.split(key, 8)

    def rnd(k, shape, fan_in):
        return jax.random.normal(k, shape, jnp.float32) / jnp.sqrt(fan_in)

    oh1, ow1 = (h - 8) // 4 + 1, (w - 8) // 4 + 1
    oh2, ow2 = (oh1 - 4) // 2 + 1, (ow1 - 4) // 2 + 1
    oh3, ow3 = (oh2 - 3) // 1 + 1, (ow2 - 3) // 1 + 1
    feat = 64 * oh3 * ow3

    torch_params = {
        "w1": rnd(ks[0], (32, in_ch, 8, 8), in_ch * 8 * 8),
        "b1": rnd(ks[1], (32,), in_ch * 8 * 8),
        "w2": rnd(ks[2], (64, 32, 4, 4), 32 * 4 * 4),
        "b2": rnd(ks[3], (64,), 32 * 4 * 4),
        "w3": rnd(ks[4], (64, 64, 3, 3), 64 * 3 * 3),
        "b3": rnd(ks[5], (64,), 64 * 3 * 3),
        "wfc": rnd(ks[6], (rnd_rep_size, feat), feat),
        "bfc": rnd(ks[7], (rnd_rep_size,), feat),
    }
    return torch_params, feat


def prepare_params(torch_params):
    """One-time conversion: flatten conv weights to (OC, C*KH*KW) bf16 matrices,
    reshape biases to f32 (OC, 1) columns, keep fc weight as (rep, feat) bf16."""
    def wmat(w):
        return w.reshape(w.shape[0], -1).astype(jnp.bfloat16)

    def bcol(b):
        return b.reshape(-1, 1).astype(jnp.float32)

    return {
        "w1m": wmat(torch_params["w1"]), "b1": bcol(torch_params["b1"]),
        "w2m": wmat(torch_params["w2"]), "b2": bcol(torch_params["b2"]),
        "w3m": wmat(torch_params["w3"]), "b3": bcol(torch_params["b3"]),
        "wfc": torch_params["wfc"].astype(jnp.bfloat16),
        "bfc": bcol(torch_params["bfc"]),
    }


if __name__ == "__main__":
    # Small Atari-like config: args.state_shape[:2] = (36, 36) -> input (1, 36, 36)
    # feature map sizes: 36 ->(k8,s4) 8 ->(k4,s2) 3 ->(k3,s1) 1  => feature_size = 64
    batch, in_ch, H, W = 2, 1, 36, 36
    rnd_rep_size = 32

    key = jax.random.PRNGKey(0)
    k_params, k_x = jax.random.split(key)
    torch_params, feat = init_params_torch_layout(k_params, in_ch, H, W, rnd_rep_size)
    params = prepare_params(torch_params)

    x = jax.random.normal(k_x, (batch, in_ch, H, W), jnp.float32)

    fwd = jax.jit(target_rnd_forward)
    out = jax.block_until_ready(fwd(x, params))

    assert out.shape == (batch, rnd_rep_size), out.shape
    assert bool(jnp.all(jnp.isfinite(out)))
    print("KERNEL_OK")
</pallas_src>

<mosaic_0001>
module attributes {stable_mosaic.version = 11 : i64} {
  func.func @_matmul_t_kernel(%arg0: i32, %arg1: memref<32x64xbf16, #tpu.memory_space<vmem>>, %arg2: memref<64x128xbf16, #tpu.memory_space<vmem>>, %arg3: memref<32x1xf32, #tpu.memory_space<vmem>>, %arg4: memref<32x128xf32, #tpu.memory_space<vmem>>) attributes {dimension_semantics = [#tpu.dimension_semantics<parallel>], iteration_bounds = array<i64: 1>, scalar_prefetch = 0 : i64, scratch_operands = 0 : i64, tpu.core_type = #tpu.core_type<tc>, window_params = [{pipeline_mode = #tpu.pipeline_mode<synchronous>, transform_indices = @transform_0, window_bounds = array<i64: 32, 64>}, {transform_indices = @transform_1, window_bounds = array<i64: 64, 128>}, {pipeline_mode = #tpu.pipeline_mode<synchronous>, transform_indices = @transform_2, window_bounds = array<i64: 32, 1>}, {transform_indices = @transform_3, window_bounds = array<i64: 32, 128>}]} {
    %c0 = arith.constant 0 : index
    %c0_0 = arith.constant 0 : index
    %0 = vector.load %arg1[%c0, %c0_0] : memref<32x64xbf16, #tpu.memory_space<vmem>>, vector<32x64xbf16>
    %c0_1 = arith.constant 0 : index
    %c0_2 = arith.constant 0 : index
    %1 = vector.load %arg2[%c0_1, %c0_2] : memref<64x128xbf16, #tpu.memory_space<vmem>>, vector<64x128xbf16>
    %cst = arith.constant dense<0.000000e+00> : vector<32x128xf32>
    %2 = tpu.matmul %0, %1, %cst {dimension_numbers = #tpu.dot_dimension_numbers<[1], [0], [0], [1], [0, 0, 1, 1], [], []>} : vector<32x64xbf16>, vector<64x128xbf16>, vector<32x128xf32> -> vector<32x128xf32>
    %c0_3 = arith.constant 0 : index
    %c0_4 = arith.constant 0 : index
    %3 = vector.load %arg3[%c0_3, %c0_4] : memref<32x1xf32, #tpu.memory_space<vmem>>, vector<32x1xf32>
    %4 = vector.broadcast %3 : vector<32x1xf32> to vector<32x128xf32>
    %5 = arith.addf %2, %4 : vector<32x128xf32>
    %cst_5 = arith.constant 0.000000e+00 : f32
    %6 = vector.broadcast %cst_5 : f32 to vector<32x128xf32>
    %7 = arith.maximumf %5, %6 : vector<32x128xf32>
    %c0_6 = arith.constant 0 : index
    %c0_7 = arith.constant 0 : index
    %8 = vector.load %arg4[%c0_6, %c0_7] : memref<32x128xf32, #tpu.memory_space<vmem>>, vector<32x128xf32>
    tpu.vector_store %arg4[%c0_6, %c0_7], %7 {strides = array<i32>} : memref<32x128xf32, #tpu.memory_space<vmem>>, vector<32x128xf32>,
    return
  }
  func.func @transform_0(%arg0: i32) -> (i32, i32) {
    %c0_i32 = arith.constant 0 : i32
    %c0_i32_0 = arith.constant 0 : i32
    %c0_i32_1 = arith.constant 0 : i32
    return %c0_i32, %c0_i32_0 : i32, i32
  }
  func.func @transform_1(%arg0: i32) -> (i32, i32) {
    %c0_i32 = arith.constant 0 : i32
    %c0_i32_0 = arith.constant 0 : i32
    return %c0_i32, %arg0 : i32, i32
  }
  func.func @transform_2(%arg0: i32) -> (i32, i32) {
    %c0_i32 = arith.constant 0 : i32
    %c0_i32_0 = arith.constant 0 : i32
    %c0_i32_1 = arith.constant 0 : i32
    return %c0_i32, %c0_i32_0 : i32, i32
  }
  func.func @transform_3(%arg0: i32) -> (i32, i32) {
    %c0_i32 = arith.constant 0 : i32
    %c0_i32_0 = arith.constant 0 : i32
    return %c0_i32, %arg0 : i32, i32
  }
}

module attributes {stable_mosaic.version = 11 : i64} {
  func.func @_matmul_t_kernel(%arg0: i32, %arg1: memref<64x512xbf16, #tpu.memory_space<vmem>>, %arg2: memref<512x18xbf16, #tpu.memory_space<vmem>>, %arg3: memref<64x1xf32, #tpu.memory_space<vmem>>, %arg4: memref<64x18xf32, #tpu.memory_space<vmem>>) attributes {dimension_semantics = [#tpu.dimension_semantics<parallel>], iteration_bounds = array<i64: 1>, scalar_prefetch = 0 : i64, scratch_operands = 0 : i64, tpu.core_type = #tpu.core_type<tc>, window_params = [{pipeline_mode = #tpu.pipeline_mode<synchronous>, transform_indices = @transform_0, window_bounds = array<i64: 64, 512>}, {transform_indices = @transform_1, window_bounds = array<i64: 512, 18>}, {pipeline_mode = #tpu.pipeline_mode<synchronous>, transform_indices = @transform_2, window_bounds = array<i64: 64, 1>}, {transform_indices = @transform_3, window_bounds = array<i64: 64, 18>}]} {
    %c0 = arith.constant 0 : index
    %c0_0 = arith.constant 0 : index
    %0 = vector.load %arg1[%c0, %c0_0] : memref<64x512xbf16, #tpu.memory_space<vmem>>, vector<64x512xbf16>
    %c0_1 = arith.constant 0 : index
    %c0_2 = arith.constant 0 : index
    %1 = vector.load %arg2[%c0_1, %c0_2] : memref<512x18xbf16, #tpu.memory_space<vmem>>, vector<512x18xbf16>
    %cst = arith.constant dense<0.000000e+00> : vector<64x18xf32>
    %2 = tpu.matmul %0, %1, %cst {dimension_numbers = #tpu.dot_dimension_numbers<[1], [0], [0], [1], [0, 0, 1, 1], [], []>} : vector<64x512xbf16>, vector<512x18xbf16>, vector<64x18xf32> -> vector<64x18xf32>
    %c0_3 = arith.constant 0 : index
    %c0_4 = arith.constant 0 : index
    %3 = vector.load %arg3[%c0_3, %c0_4] : memref<64x1xf32, #tpu.memory_space<vmem>>, vector<64x1xf32>
    %4 = vector.broadcast %3 : vector<64x1xf32> to vector<64x18xf32>
    %5 = arith.addf %2, %4 : vector<64x18xf32>
    %cst_5 = arith.constant 0.000000e+00 : f32
    %6 = vector.broadcast %cst_5 : f32 to vector<64x18xf32>
    %7 = arith.maximumf %5, %6 : vector<64x18xf32>
    %c0_6 = arith.constant 0 : index
    %c0_7 = arith.constant 0 : index
    %8 = vector.load %arg4[%c0_6, %c0_7] : memref<64x18xf32, #tpu.memory_space<vmem>>, vector<64x18xf32>
    tpu.vector_store %arg4[%c0_6, %c0_7], %7 {strides = array<i32>} : memref<64x18xf32, #tpu.memory_space<vmem>>, vector<64x18xf32>,
    return
  }
  func.func @transform_0(%arg0: i32) -> (i32, i32) {
    %c0_i32 = arith.constant 0 : i32
    %c0_i32_0 = arith.constant 0 : i32
    %c0_i32_1 = arith.constant 0 : i32
    return %c0_i32, %c0_i32_0 : i32, i32
  }
  func.func @transform_1(%arg0: i32) -> (i32, i32) {
    %c0_i32 = arith.constant 0 : i32
    %c0_i32_0 = arith.constant 0 : i32
    return %c0_i32, %arg0 : i32, i32
  }
  func.func @transform_2(%arg0: i32) -> (i32, i32) {
    %c0_i32 = arith.constant 0 : i32
    %c0_i32_0 = arith.constant 0 : i32
    %c0_i32_1 = arith.constant 0 : i32
    return %c0_i32, %c0_i32_0 : i32, i32
  }
  func.func @transform_3(%arg0: i32) -> (i32, i32) {
    %c0_i32 = arith.constant 0 : i32
    %c0_i32_0 = arith.constant 0 : i32
    return %c0_i32, %arg0 : i32, i32
  }
}

module attributes {stable_mosaic.version = 11 : i64} {
  func.func @_matmul_t_kernel(%arg0: i32, %arg1: memref<64x576xbf16, #tpu.memory_space<vmem>>, %arg2: memref<576x2xbf16, #tpu.memory_space<vmem>>, %arg3: memref<64x1xf32, #tpu.memory_space<vmem>>, %arg4: memref<64x2xf32, #tpu.memory_space<vmem>>) attributes {dimension_semantics = [#tpu.dimension_semantics<parallel>], iteration_bounds = array<i64: 1>, scalar_prefetch = 0 : i64, scratch_operands = 0 : i64, tpu.core_type = #tpu.core_type<tc>, window_params = [{pipeline_mode = #tpu.pipeline_mode<synchronous>, transform_indices = @transform_0, window_bounds = array<i64: 64, 576>}, {transform_indices = @transform_1, window_bounds = array<i64: 576, 2>}, {pipeline_mode = #tpu.pipeline_mode<synchronous>, transform_indices = @transform_2, window_bounds = array<i64: 64, 1>}, {transform_indices = @transform_3, window_bounds = array<i64: 64, 2>}]} {
    %c0 = arith.constant 0 : index
    %c0_0 = arith.constant 0 : index
    %0 = vector.load %arg1[%c0, %c0_0] : memref<64x576xbf16, #tpu.memory_space<vmem>>, vector<64x576xbf16>
    %c0_1 = arith.constant 0 : index
    %c0_2 = arith.constant 0 : index
    %1 = vector.load %arg2[%c0_1, %c0_2] : memref<576x2xbf16, #tpu.memory_space<vmem>>, vector<576x2xbf16>
    %cst = arith.constant dense<0.000000e+00> : vector<64x2xf32>
    %2 = tpu.matmul %0, %1, %cst {dimension_numbers = #tpu.dot_dimension_numbers<[1], [0], [0], [1], [0, 0, 1, 1], [], []>} : vector<64x576xbf16>, vector<576x2xbf16>, vector<64x2xf32> -> vector<64x2xf32>
    %c0_3 = arith.constant 0 : index
    %c0_4 = arith.constant 0 : index
    %3 = vector.load %arg3[%c0_3, %c0_4] : memref<64x1xf32, #tpu.memory_space<vmem>>, vector<64x1xf32>
    %4 = vector.broadcast %3 : vector<64x1xf32> to vector<64x2xf32>
    %5 = arith.addf %2, %4 : vector<64x2xf32>
    %cst_5 = arith.constant 0.000000e+00 : f32
    %6 = vector.broadcast %cst_5 : f32 to vector<64x2xf32>
    %7 = arith.maximumf %5, %6 : vector<64x2xf32>
    %c0_6 = arith.constant 0 : index
    %c0_7 = arith.constant 0 : index
    %8 = vector.load %arg4[%c0_6, %c0_7] : memref<64x2xf32, #tpu.memory_space<vmem>>, vector<64x2xf32>
    tpu.vector_store %arg4[%c0_6, %c0_7], %7 {strides = array<i32>} : memref<64x2xf32, #tpu.memory_space<vmem>>, vector<64x2xf32>,
    return
  }
  func.func @transform_0(%arg0: i32) -> (i32, i32) {
    %c0_i32 = arith.constant 0 : i32
    %c0_i32_0 = arith.constant 0 : i32
    %c0_i32_1 = arith.constant 0 : i32
    return %c0_i32, %c0_i32_0 : i32, i32
  }
  func.func @transform_1(%arg0: i32) -> (i32, i32) {
    %c0_i32 = arith.constant 0 : i32
    %c0_i32_0 = arith.constant 0 : i32
    return %c0_i32, %arg0 : i32, i32
  }
  func.func @transform_2(%arg0: i32) -> (i32, i32) {
    %c0_i32 = arith.constant 0 : i32
    %c0_i32_0 = arith.constant 0 : i32
    %c0_i32_1 = arith.constant 0 : i32
    return %c0_i32, %c0_i32_0 : i32, i32
  }
  func.func @transform_3(%arg0: i32) -> (i32, i32) {
    %c0_i32 = arith.constant 0 : i32
    %c0_i32_0 = arith.constant 0 : i32
    return %c0_i32, %arg0 : i32, i32
  }
}

module attributes {stable_mosaic.version = 11 : i64} {
  func.func @_matmul_t_kernel(%arg0: i32, %arg1: memref<32x64xbf16, #tpu.memory_space<vmem>>, %arg2: memref<64x2xbf16, #tpu.memory_space<vmem>>, %arg3: memref<32x1xf32, #tpu.memory_space<vmem>>, %arg4: memref<32x2xf32, #tpu.memory_space<vmem>>) attributes {dimension_semantics = [#tpu.dimension_semantics<parallel>], iteration_bounds = array<i64: 1>, scalar_prefetch = 0 : i64, scratch_operands = 0 : i64, tpu.core_type = #tpu.core_type<tc>, window_params = [{pipeline_mode = #tpu.pipeline_mode<synchronous>, transform_indices = @transform_0, window_bounds = array<i64: 32, 64>}, {transform_indices = @transform_1, window_bounds = array<i64: 64, 2>}, {pipeline_mode = #tpu.pipeline_mode<synchronous>, transform_indices = @transform_2, window_bounds = array<i64: 32, 1>}, {transform_indices = @transform_3, window_bounds = array<i64: 32, 2>}]} {
    %c0 = arith.constant 0 : index
    %c0_0 = arith.constant 0 : index
    %0 = vector.load %arg1[%c0, %c0_0] : memref<32x64xbf16, #tpu.memory_space<vmem>>, vector<32x64xbf16>
    %c0_1 = arith.constant 0 : index
    %c0_2 = arith.constant 0 : index
    %1 = vector.load %arg2[%c0_1, %c0_2] : memref<64x2xbf16, #tpu.memory_space<vmem>>, vector<64x2xbf16>
    %cst = arith.constant dense<0.000000e+00> : vector<32x2xf32>
    %2 = tpu.matmul %0, %1, %cst {dimension_numbers = #tpu.dot_dimension_numbers<[1], [0], [0], [1], [0, 0, 1, 1], [], []>} : vector<32x64xbf16>, vector<64x2xbf16>, vector<32x2xf32> -> vector<32x2xf32>
    %c0_3 = arith.constant 0 : index
    %c0_4 = arith.constant 0 : index
    %3 = vector.load %arg3[%c0_3, %c0_4] : memref<32x1xf32, #tpu.memory_space<vmem>>, vector<32x1xf32>
    %4 = vector.broadcast %3 : vector<32x1xf32> to vector<32x2xf32>
    %5 = arith.addf %2, %4 : vector<32x2xf32>
    %c0_5 = arith.constant 0 : index
    %c0_6 = arith.constant 0 : index
    %6 = vector.load %arg4[%c0_5, %c0_6] : memref<32x2xf32, #tpu.memory_space<vmem>>, vector<32x2xf32>
    tpu.vector_store %arg4[%c0_5, %c0_6], %5 {strides = array<i32>} : memref<32x2xf32, #tpu.memory_space<vmem>>, vector<32x2xf32>,
    return
  }
  func.func @transform_0(%arg0: i32) -> (i32, i32) {
    %c0_i32 = arith.constant 0 : i32
    %c0_i32_0 = arith.constant 0 : i32
    %c0_i32_1 = arith.constant 0 : i32
    return %c0_i32, %c0_i32_0 : i32, i32
  }
  func.func @transform_1(%arg0: i32) -> (i32, i32) {
    %c0_i32 = arith.constant 0 : i32
    %c0_i32_0 = arith.constant 0 : i32
    return %c0_i32, %arg0 : i32, i32
  }
  func.func @transform_2(%arg0: i32) -> (i32, i32) {
    %c0_i32 = arith.constant 0 : i32
    %c0_i32_0 = arith.constant 0 : i32
    %c0_i32_1 = arith.constant 0 : i32
    return %c0_i32, %c0_i32_0 : i32, i32
  }
  func.func @transform_3(%arg0: i32) -> (i32, i32) {
    %c0_i32 = arith.constant 0 : i32
    %c0_i32_0 = arith.constant 0 : i32
    return %c0_i32, %arg0 : i32, i32
  }
}

</mosaic_0001>

<bundles_post_ra>
// kernel: target_rnd_forward.4
= control target key start
LH: loop header
LB: loop body
LE: loop exit
PB: predicated region body
PF: predicated region fallthrough
CT: control target
= control target key end

     0   :  { %v162_v1 = vmov 0   ;;  %vm85_vm0 = vcmask 523264   ;;  %s225_s1 = inlined_call_operand.vmem [shape: bf16[64,128], index: 1, kind: input, shape index: {}]   ;;  %s226_s2 = inlined_call_operand.vmem [shape: f32[32,1], index: 2, kind: input, shape index: {}]   ;;  %s227_s0 = inlined_call_operand.vmem [shape: bf16[32,64], index: 0, kind: input, shape index: {}]   ;;  %s228_s3 = inlined_call_operand.vmem [shape: f32[32,128], index: 3, kind: output, shape index: {}]  }
   0x1   :  { %v154_v0 = vld [vmem:[%s225_s1 + $0x18] sm:$0xff]  ;;  %161 = vset.pattern.permute.xlu1 %v162_v1  ;;  %160 = vset.pattern.permute.xlu0 %v162_v1  ;;  %v153_v2 = vld [vmem:[%s225_s1 + $0x10] sm:$0xff]  ;;  %v27_v4 = vld [vmem:[%s226_s2] sm:$0xff] }
   0x2   :  { %96 = vmatpush.bf16.msra.mxu0 %v154_v0  ;;  %155 = vmatpush.bf16.msra.mxu1 %v154_v0  ;;  %v29_v3 = vld [vmem:[%s226_s2 + $0x10] sm:$0xff]  ;;  %v152_v5 = vld [vmem:[%s225_s1 + $0x8] sm:$0xff]  ;;  %v30_v6 = vld [vmem:[%s226_s2 + $0x18] sm:$0xff] }
   0x3   :  { %43 = vperm.xlu1 %161, %v29_v3   ;;  %33 = vperm.xlu0 %160, %v27_v4   ;;  %v28_v7 = vld [vmem:[%s226_s2 + $0x8] sm:$0xff]  ;;  %v151_v8 = vld [vmem:[%s225_s1] sm:$0xff] }
   0x4   :  { %v149_v9 = vld [vmem:[%s227_s0] sm:$0xff]  ;;  %v150_v10 = vld [vmem:[%s227_s0 + $0x8] sm:$0xff] }
   0x6   :  { %97 = vmatpush.bf16.msra.mxu0 %v153_v2  ;;  %156 = vmatpush.bf16.msra.mxu1 %v153_v2 }
   0xa   :  { %98 = vmatpush.bf16.msra.mxu0 %v152_v5  ;;  %157 = vmatpush.bf16.msra.mxu1 %v152_v5 }
   0xb   :  { %48 = vperm.xlu1 %161, %v30_v6   ;;  %38 = vperm.xlu0 %160, %v28_v7  }
   0xe   :  { %99 = vmatpush.bf16.msra.mxu0 %v151_v8  ;;  %158 = vmatpush.bf16.msra.mxu1 %v151_v8 }
  0x11   :  { %147 = vmatmul.msk.bf16.vlgmr.msra.gmra.mxu0 %vm85_vm0, %v149_v9  ;;  %148 = vmatmul.msk.bf16.vlgmr.msra.gmra.mxu1 %vm85_vm0, %v150_v10 }
  0x75   :  { %v44_v11 = vpop.permute.xlu1 %43  ;;  %v34_v12 = vpop.permute.xlu0 %33 }
  0x7d   :  { %v49_v19 = vpop.permute.xlu1 %48  ;;  %v39_v20 = vpop.permute.xlu0 %38 }
  0x8e   :  { %v101_v13 = vpop.f32.mrf.mxu0  ;;  %v106_v14 = vpop.f32.mrf.mxu1 }
  0x8f   :  { %v102_v15 = vadd.f32 %v101_v13, %v34_v12  ;;  %v107_v16 = vadd.f32 %v106_v14, %v44_v11 }
  0x91   :  { %v111_v17 = vmax.f32 %v102_v15, 0.0  ;;  %v113_v18 = vmax.f32 %v107_v16, 0.0 }
  0x93   :  { %115 = vst [vmem:[%s228_s3] sm:$0xff] %v111_v17 }
  0x94   :  { %117 = vst [vmem:[%s228_s3 + $0x10] sm:$0xff] %v113_v18 }
  0x96   :  { %v103_v21 = vpop.f32.mrf.mxu0  ;;  %v108_v22 = vpop.f32.mrf.mxu1 }
  0x97   :  { %v104_v23 = vadd.f32 %v103_v21, %v39_v20  ;;  %v109_v24 = vadd.f32 %v108_v22, %v49_v19 }
  0x99   :  { %v112_v25 = vmax.f32 %v104_v23, 0.0  ;;  %v114_v26 = vmax.f32 %v109_v24, 0.0 }
  0x9b   :  { %116 = vst [vmem:[%s228_s3 + $0x8] sm:$0xff] %v112_v25 }
  0x9c   :  { %118 = vst [vmem:[%s228_s3 + $0x18] sm:$0xff] %v114_v26 }

// kernel: target_rnd_forward.5
= control target key start
LH: loop header
LB: loop body
LE: loop exit
PB: predicated region body
PF: predicated region fallthrough
CT: control target
= control target key end

     0   :  { %v795_v8 = vmov 0   ;;  %vm538_vm0 = vcmask 146432   ;;  %s1064_s1 = inlined_call_operand.vmem [shape: bf16[512,18], index: 1, kind: input, shape index: {}]   ;;  %s1065_s2 = inlined_call_operand.vmem [shape: f32[64,1], index: 2, kind: input, shape index: {}]   ;;  %s1066_s0 = inlined_call_operand.vmem [shape: bf16[64,512], index: 0, kind: input, shape index: {}]   ;;  %s1067_s3 = inlined_call_operand.vmem [shape: f32[64,18], index: 3, kind: output, shape index: {}]  }
   0x1   :  { %v766_v0 = vld [vmem:[%s1064_s1 + $0x38] sm:$0xff]  ;;  %v765_v4 = vld [vmem:[%s1064_s1 + $0x30] sm:$0xff]  ;;  %792 = vset.pattern.permute.xlu0 %v795_v8  ;;  %793 = vset.pattern.permute.xlu1 %v795_v8  ;;  %v764_v9 = vld [vmem:[%s1064_s1 + $0x28] sm:$0xff] }
   0x2   :  { %v774_v1 = vld [vmem:[%s1064_s1 + $0x78] sm:$0xff]  ;;  %414 = vmatpush.bf16.msra.mxu0 %v766_v0  ;;  %v773_v5 = vld [vmem:[%s1064_s1 + $0x70] sm:$0xff]  ;;  %794 = vset.pattern.permute.xlu2 %v795_v8  ;;  %v772_v10 = vld [vmem:[%s1064_s1 + $0x68] sm:$0xff] }
   0x3   :  { %v782_v2 = vld [vmem:[%s1064_s1 + $0xb8] sm:$0xff]  ;;  %443 = vmatpush.bf16.msra.mxu1 %v774_v1  ;;  %v781_v6 = vld [vmem:[%s1064_s1 + $0xb0] sm:$0xff]  ;;  %v780_v11 = vld [vmem:[%s1064_s1 + $0xa8] sm:$0xff] }
   0x4   :  { %v790_v3 = vld [vmem:[%s1064_s1 + $0xf8] sm:$0xff]  ;;  %472 = vmatpush.bf16.msra.mxu2 %v782_v2  ;;  %v789_v7 = vld [vmem:[%s1064_s1 + $0xf0] sm:$0xff]  ;;  %v788_v12 = vld [vmem:[%s1064_s1 + $0xe8] sm:$0xff] }
   0x5   :  { %501 = vmatpush.bf16.msra.mxu3 %v790_v3  ;;  %v763_v13 = vld [vmem:[%s1064_s1 + $0x20] sm:$0xff]  ;;  %v762_v18 = vld [vmem:[%s1064_s1 + $0x18] sm:$0xff]  ;;  %v761_v22 = vld [vmem:[%s1064_s1 + $0x10] sm:$0xff] }
   0x6   :  { %415 = vmatpush.bf16.msra.mxu0 %v765_v4  ;;  %v771_v14 = vld [vmem:[%s1064_s1 + $0x60] sm:$0xff]  ;;  %v770_v19 = vld [vmem:[%s1064_s1 + $0x58] sm:$0xff]  ;;  %v769_v23 = vld [vmem:[%s1064_s1 + $0x50] sm:$0xff] }
   0x7   :  { %444 = vmatpush.bf16.msra.mxu1 %v773_v5  ;;  %v779_v15 = vld [vmem:[%s1064_s1 + $0xa0] sm:$0xff]  ;;  %v778_v20 = vld [vmem:[%s1064_s1 + $0x98] sm:$0xff]  ;;  %v96_v24 = vld [vmem:[%s1065_s2 + $0x10] sm:$0xff] }
   0x8   :  { %473 = vmatpush.bf16.msra.mxu2 %v781_v6  ;;  %v787_v16 = vld [vmem:[%s1064_s1 + $0xe0] sm:$0xff]  ;;  %v786_v21 = vld [vmem:[%s1064_s1 + $0xd8] sm:$0xff]  ;;  %v777_v25 = vld [vmem:[%s1064_s1 + $0x90] sm:$0xff]  ;;  %114 = vperm.xlu1 %793, %v96_v24  }
   0x9   :  { %502 = vmatpush.bf16.msra.mxu3 %v789_v7  ;;  %v94_v17 = vld [vmem:[%s1065_s2] sm:$0xff]  ;;  %v785_v26 = vld [vmem:[%s1064_s1 + $0xd0] sm:$0xff]  ;;  %v95_v27 = vld [vmem:[%s1065_s2 + $0x8] sm:$0xff] }
   0xa   :  { %416 = vmatpush.bf16.msra.mxu0 %v764_v9  ;;  %104 = vperm.xlu0 %792, %v94_v17   ;;  %v760_v28 = vld [vmem:[%s1064_s1 + $0x8] sm:$0xff]  ;;  %v759_v32 = vld [vmem:[%s1064_s1] sm:$0xff]  ;;  %v745_v37 = vld [vmem:[%s1066_s0 + $0xc] sm:$0xf0] }
   0xb   :  { %445 = vmatpush.bf16.msra.mxu1 %v772_v10  ;;  %v768_v29 = vld [vmem:[%s1064_s1 + $0x48] sm:$0xff]  ;;  %v767_v33 = vld [vmem:[%s1064_s1 + $0x40] sm:$0xff]  ;;  %v555_v39 = vld [vmem:[%s1066_s0 + $0x10] sm:$0xf0] }
   0xc   :  { %474 = vmatpush.bf16.msra.mxu2 %v780_v11  ;;  %v776_v30 = vld [vmem:[%s1064_s1 + $0x88] sm:$0xff]  ;;  %v775_v34 = vld [vmem:[%s1064_s1 + $0x80] sm:$0xff]  ;;  %v746_v41 = vld [vmem:[%s1066_s0 + $0x14] sm:$0xf0] }
   0xd   :  { %503 = vmatpush.bf16.msra.mxu3 %v788_v12  ;;  %v784_v31 = vld [vmem:[%s1064_s1 + $0xc8] sm:$0xff]  ;;  %v783_v35 = vld [vmem:[%s1064_s1 + $0xc0] sm:$0xff]  ;;  %v563_v43 = vld [vmem:[%s1066_s0 + $0x18] sm:$0xf0] }
   0xe   :  { %417 = vmatpush.bf16.msra.mxu0 %v763_v13  ;;  %v553_v36 = vld [vmem:[%s1066_s0] sm:$0xf]  ;;  %v743_v38 = vld [vmem:[%s1066_s0 + $0x4] sm:$0xf]  ;;  %v561_v40 = vld [vmem:[%s1066_s0 + $0x8] sm:$0xf] }
   0xf   :  { %446 = vmatpush.bf16.msra.mxu1 %v771_v14  ;;  %v744_v42 = vld [vmem:[%s1066_s0 + $0xc] sm:$0xf]  ;;  %v554_v44 = vor.u32 %v745_v37, %v553_v36  ;;  %v558_v45 = vor.u32 %v743_v38, %v555_v39  ;;  %v562_v46 = vor.u32 %v746_v41, %v561_v40  ;;  %v97_v48 = vld [vmem:[%s1065_s2 + $0x18] sm:$0xff]  ;;  %v569_v49 = vld [vmem:[%s1066_s0 + $0x20] sm:$0xf] }
  0x10   :  { %475 = vmatpush.bf16.msra.mxu2 %v779_v15  ;;  %v566_v47 = vor.u32 %v744_v42, %v563_v43  ;;  %119 = vperm.xlu1 %793, %v97_v48   ;;  %v749_v50 = vld [vmem:[%s1066_s0 + $0x2c] sm:$0xf0]  ;;  %v747_v51 = vld [vmem:[%s1066_s0 + $0x24] sm:$0xf]  ;;  %v571_v52 = vld [vmem:[%s1066_s0 + $0x30] sm:$0xf0] }
  0x11   :  { %504 = vmatpush.bf16.msra.mxu3 %v787_v16  ;;  %v577_v53 = vld [vmem:[%s1066_s0 + $0x28] sm:$0xf]  ;;  %v750_v54 = vld [vmem:[%s1066_s0 + $0x34] sm:$0xf0]  ;;  %v748_v55 = vld [vmem:[%s1066_s0 + $0x2c] sm:$0xf]  ;;  %v570_v57 = vor.u32 %v749_v50, %v569_v49  ;;  %v574_v58 = vor.u32 %v747_v51, %v571_v52 }
  0x12   :  { %418 = vmatpush.bf16.msra.mxu0 %v762_v18  ;;  %109 = vperm.xlu0 %792, %v95_v27   ;;  %v579_v56 = vld [vmem:[%s1066_s0 + $0x38] sm:$0xf0]  ;;  %v578_v59 = vor.u32 %v750_v54, %v577_v53  ;;  %v100_v62 = vld [vmem:[%s1065_s2 + $0x30] sm:$0xff]  ;;  %v98_v63 = vld [vmem:[%s1065_s2 + $0x20] sm:$0xff] }
  0x13   :  { %447 = vmatpush.bf16.msra.mxu1 %v770_v19  ;;  %v582_v60 = vor.u32 %v748_v55, %v579_v56  ;;  %v101_v61 = vld [vmem:[%s1065_s2 + $0x38] sm:$0xff]  ;;  %124 = vperm.xlu2 %794, %v98_v63   ;;  %v585_v0 = vld [vmem:[%s1066_s0 + $0x40] sm:$0xf]  ;;  %v753_v1 = vld [vmem:[%s1066_s0 + $0x4c] sm:$0xf0] }
  0x14   :  { %476 = vmatpush.bf16.msra.mxu2 %v778_v20  ;;  %v99_v2 = vld [vmem:[%s1065_s2 + $0x28] sm:$0xff]  ;;  %v751_v3 = vld [vmem:[%s1066_s0 + $0x44] sm:$0xf]  ;;  %v587_v4 = vld [vmem:[%s1066_s0 + $0x50] sm:$0xf0]  ;;  %v586_v9 = vor.u32 %v753_v1, %v585_v0 }
  0x15   :  { %505 = vmatpush.bf16.msra.mxu3 %v786_v21  ;;  %v593_v5 = vld [vmem:[%s1066_s0 + $0x48] sm:$0xf]  ;;  %v754_v6 = vld [vmem:[%s1066_s0 + $0x54] sm:$0xf0]  ;;  %v752_v7 = vld [vmem:[%s1066_s0 + $0x4c] sm:$0xf]  ;;  %v590_v10 = vor.u32 %v751_v3, %v587_v4 }
  0x16   :  { %419 = vmatpush.bf16.msra.mxu0 %v761_v22  ;;  %v595_v8 = vld [vmem:[%s1066_s0 + $0x58] sm:$0xf0]  ;;  %v594_v11 = vor.u32 %v754_v6, %v593_v5  ;;  %v601_v13 = vld [vmem:[%s1066_s0 + $0x60] sm:$0xf]  ;;  %v757_v14 = vld [vmem:[%s1066_s0 + $0x6c] sm:$0xf0] }
  0x17   :  { %448 = vmatpush.bf16.msra.mxu1 %v769_v23  ;;  %v598_v12 = vor.u32 %v752_v7, %v595_v8  ;;  %v755_v15 = vld [vmem:[%s1066_s0 + $0x64] sm:$0xf]  ;;  %v603_v16 = vld [vmem:[%s1066_s0 + $0x70] sm:$0xf0]  ;;  %v609_v17 = vld [vmem:[%s1066_s0 + $0x68] sm:$0xf]  ;;  %v602_v21 = vor.u32 %v757_v14, %v601_v13 }
  0x18   :  { %477 = vmatpush.bf16.msra.mxu2 %v777_v25  ;;  %139 = vperm.xlu1 %793, %v101_v61   ;;  %v758_v18 = vld [vmem:[%s1066_s0 + $0x74] sm:$0xf0]  ;;  %v756_v19 = vld [vmem:[%s1066_s0 + $0x6c] sm:$0xf]  ;;  %v611_v20 = vld [vmem:[%s1066_s0 + $0x78] sm:$0xf0]  ;;  %v606_v22 = vor.u32 %v755_v15, %v603_v16 }
  0x19   :  { %506 = vmatpush.bf16.msra.mxu3 %v785_v26  ;;  %v610_v23 = vor.u32 %v758_v18, %v609_v17  ;;  %v614_v24 = vor.u32 %v756_v19, %v611_v20 }
  0x1a   :  { %420 = vmatpush.bf16.msra.mxu0 %v760_v28  ;;  %134 = vperm.xlu0 %792, %v100_v62  }
  0x1b   :  { %449 = vmatpush.bf16.msra.mxu1 %v768_v29  ;;  %129 = vperm.xlu2 %794, %v99_v2  }
  0x1c   :  { %478 = vmatpush.bf16.msra.mxu2 %v776_v30 }
  0x1d   :  { %507 = vmatpush.bf16.msra.mxu3 %v784_v31 }
  0x1e   :  { %421 = vmatpush.bf16.msra.mxu0 %v759_v32 }
  0x1f   :  { %450 = vmatpush.bf16.msra.mxu1 %v767_v33 }
  0x20   :  { %479 = vmatpush.bf16.msra.mxu2 %v775_v34 }
  0x21   :  { %508 = vmatpush.bf16.msra.mxu3 %v783_v35  ;;  %422 = vmatmul.bf16.vlgmr.msra.gmra.mxu0 %v554_v44 }
  0x22   :  { %451 = vmatmul.bf16.vlgmr.msra.gmra.mxu1 %v558_v45 }
  0x23   :  { %480 = vmatmul.bf16.vlgmr.msra.gmra.mxu2 %v562_v46 }
  0x24   :  { %509 = vmatmul.bf16.vlgmr.msra.gmra.mxu3 %v566_v47 }
  0x31   :  { %427 = vmatmul.bf16.gmra.mxu0 %v570_v57 }
  0x32   :  { %456 = vmatmul.bf16.gmra.mxu1 %v574_v58 }
  0x33   :  { %485 = vmatmul.bf16.gmra.mxu2 %v578_v59 }
  0x34   :  { %514 = vmatmul.bf16.gmra.mxu3 %v582_v60 }
  0x41   :  { %432 = vmatmul.bf16.gmra.mxu0 %v586_v9 }
  0x42   :  { %461 = vmatmul.bf16.gmra.mxu1 %v590_v10 }
  0x43   :  { %490 = vmatmul.bf16.gmra.mxu2 %v594_v11 }
  0x44   :  { %519 = vmatmul.bf16.gmra.mxu3 %v598_v12 }
  0x51   :  { %437 = vmatmul.bf16.gmra.mxu0 %v602_v21 }
  0x52   :  { %466 = vmatmul.bf16.gmra.mxu1 %v606_v22 }
  0x53   :  { %495 = vmatmul.bf16.gmra.mxu2 %v610_v23 }
  0x54   :  { %524 = vmatmul.bf16.gmra.mxu3 %v614_v24 }
  0x6d   :  { %v125_v59 = vpop.permute.xlu2 %124 }
  0x75   :  { %v130_v6 = vpop.permute.xlu2 %129 }
  0x7a   :  { %v115_v39 = vpop.permute.xlu1 %114 }
  0x7c   :  { %v105_v25 = vpop.permute.xlu0 %104 }
  0x82   :  { %v120_v50 = vpop.permute.xlu1 %119 }
  0x84   :  { %v110_v30 = vpop.permute.xlu0 %109 }
  0x8c   :  { %v135_v20 = vpop.permute.xlu0 %134 }
  0x9e   :  { %v423_v26 = vpop.f32.mrf.mxu0 }
  0x9f   :  { %v452_v27 = vpop.f32.mrf.mxu1  ;;  %v424_v28 = vadd.f32 %v423_v26, %v105_v25 }
  0xa1   :  { %v453_v29 = vadd.f32 %v452_v27, %v424_v28 }
  0xa6   :  { %v481_v31 = vpop.f32.mrf.mxu2  ;;  %v425_v34 = vpop.f32.mrf.mxu0 }
  0xa7   :  { %v510_v32 = vpop.f32.mrf.mxu3  ;;  %v482_v33 = vadd.f32 %v481_v31, %v453_v29  ;;  %v454_v35 = vpop.f32.mrf.mxu1  ;;  %v426_v37 = vadd.f32 %v425_v34, %v110_v30 }
  0xa8   :  { %v140_v30 = vpop.permute.xlu1 %139 }
  0xa9   :  { %v511_v36 = vadd.f32 %v510_v32, %v482_v33  ;;  %v455_v40 = vadd.f32 %v454_v35, %v426_v37 }
  0xab   :  { %v530_v38 = vmax.f32 %v511_v36, 0.0 }
  0xad   :  { %539 = vst.msk [vmem:[%s1067_s3] sm:$0xff] %vm538_vm0, %v530_v38 }
  0xae   :  { %v483_v41 = vpop.f32.mrf.mxu2  ;;  %v428_v44 = vpop.f32.mrf.mxu0 }
  0xaf   :  { %v512_v42 = vpop.f32.mrf.mxu3  ;;  %v484_v43 = vadd.f32 %v483_v41, %v455_v40  ;;  %v457_v45 = vpop.f32.mrf.mxu1  ;;  %v429_v46 = vadd.f32 %v428_v44, %v115_v39 }
  0xb1   :  { %v513_v47 = vadd.f32 %v512_v42, %v484_v43  ;;  %v458_v49 = vadd.f32 %v457_v45, %v429_v46 }
  0xb3   :  { %v531_v48 = vmax.f32 %v513_v47, 0.0 }
  0xb5   :  { %540 = vst.msk [vmem:[%s1067_s3 + $0x8] sm:$0xff] %vm538_vm0, %v531_v48 }
  0xb6   :  { %v486_v51 = vpop.f32.mrf.mxu2  ;;  %v430_v54 = vpop.f32.mrf.mxu0 }
  0xb7   :  { %v515_v52 = vpop.f32.mrf.mxu3  ;;  %v487_v53 = vadd.f32 %v486_v51, %v458_v49  ;;  %v459_v55 = vpop.f32.mrf.mxu1  ;;  %v431_v57 = vadd.f32 %v430_v54, %v120_v50 }
  0xb9   :  { %v516_v56 = vadd.f32 %v515_v52, %v487_v53  ;;  %v460_v60 = vadd.f32 %v459_v55, %v431_v57 }
  0xbb   :  { %v532_v58 = vmax.f32 %v516_v56, 0.0 }
  0xbd   :  { %541 = vst.msk [vmem:[%s1067_s3 + $0x10] sm:$0xff] %vm538_vm0, %v532_v58 }
  0xbe   :  { %v488_v61 = vpop.f32.mrf.mxu2  ;;  %v433_v0 = vpop.f32.mrf.mxu0 }
  0xbf   :  { %v517_v62 = vpop.f32.mrf.mxu3  ;;  %v489_v63 = vadd.f32 %v488_v61, %v460_v60  ;;  %v462_v1 = vpop.f32.mrf.mxu1  ;;  %v434_v2 = vadd.f32 %v433_v0, %v125_v59 }
  0xc1   :  { %v518_v3 = vadd.f32 %v517_v62, %v489_v63  ;;  %v463_v5 = vadd.f32 %v462_v1, %v434_v2 }
  0xc3   :  { %v533_v4 = vmax.f32 %v518_v3, 0.0 }
  0xc5   :  { %542 = vst.msk [vmem:[%s1067_s3 + $0x18] sm:$0xff] %vm538_vm0, %v533_v4 }
  0xc6   :  { %v491_v7 = vpop.f32.mrf.mxu2  ;;  %v435_v10 = vpop.f32.mrf.mxu0 }
  0xc7   :  { %v520_v8 = vpop.f32.mrf.mxu3  ;;  %v492_v9 = vadd.f32 %v491_v7, %v463_v5  ;;  %v464_v11 = vpop.f32.mrf.mxu1  ;;  %v436_v13 = vadd.f32 %v435_v10, %v130_v6 }
  0xc9   :  { %v521_v12 = vadd.f32 %v520_v8, %v492_v9  ;;  %v465_v15 = vadd.f32 %v464_v11, %v436_v13 }
  0xcb   :  { %v534_v14 = vmax.f32 %v521_v12, 0.0 }
  0xcd   :  { %543 = vst.msk [vmem:[%s1067_s3 + $0x20] sm:$0xff] %vm538_vm0, %v534_v14 }
  0xce   :  { %v493_v16 = vpop.f32.mrf.mxu2  ;;  %v438_v19 = vpop.f32.mrf.mxu0 }
  0xcf   :  { %v522_v17 = vpop.f32.mrf.mxu3  ;;  %v494_v18 = vadd.f32 %v493_v16, %v465_v15  ;;  %v439_v22 = vadd.f32 %v438_v19, %v135_v20  ;;  %v467_v23 = vpop.f32.mrf.mxu1 }
  0xd1   :  { %v523_v21 = vadd.f32 %v522_v17, %v494_v18  ;;  %v468_v25 = vadd.f32 %v467_v23, %v439_v22 }
  0xd3   :  { %v535_v24 = vmax.f32 %v523_v21, 0.0 }
  0xd5   :  { %544 = vst.msk [vmem:[%s1067_s3 + $0x28] sm:$0xff] %vm538_vm0, %v535_v24 }
  0xd6   :  { %v496_v26 = vpop.f32.mrf.mxu2  ;;  %v440_v29 = vpop.f32.mrf.mxu0 }
  0xd7   :  { %v525_v27 = vpop.f32.mrf.mxu3  ;;  %v497_v28 = vadd.f32 %v496_v26, %v468_v25  ;;  %v441_v32 = vadd.f32 %v440_v29, %v140_v30  ;;  %v469_v34 = vpop.f32.mrf.mxu1 }
  0xd9   :  { %v526_v31 = vadd.f32 %v525_v27, %v497_v28  ;;  %v470_v35 = vadd.f32 %v469_v34, %v441_v32 }
  0xdb   :  { %v536_v33 = vmax.f32 %v526_v31, 0.0 }
  0xdd   :  { %545 = vst.msk [vmem:[%s1067_s3 + $0x30] sm:$0xff] %vm538_vm0, %v536_v33 }
  0xde   :  { %v498_v36 = vpop.f32.mrf.mxu2 }
  0xdf   :  { %v499_v37 = vadd.f32 %v498_v36, %v470_v35  ;;  %v527_v38 = vpop.f32.mrf.mxu3 }
  0xe1   :  { %v528_v39 = vadd.f32 %v527_v38, %v499_v37 }
  0xe3   :  { %v537_v40 = vmax.f32 %v528_v39, 0.0 }
  0xe5   :  { %546 = vst.msk [vmem:[%s1067_s3 + $0x38] sm:$0xff] %vm538_vm0, %v537_v40 }

// kernel: target_rnd_forward.6
= control target key start
LH: loop header
LB: loop body
LE: loop exit
PB: predicated region body
PF: predicated region fallthrough
CT: control target
= control target key end

     0   :  { %v958_v6 = vmov 0   ;;  %vm475_vm0 = vcmask 523264   ;;  %vm641_vm1 = vcmask 15360   ;;  %s1273_s1 = inlined_call_operand.vmem [shape: bf16[576,2], index: 1, kind: input, shape index: {}]   ;;  %s1274_s2 = inlined_call_operand.vmem [shape: f32[64,1], index: 2, kind: input, shape index: {}]   ;;  %s1275_s0 = inlined_call_operand.vmem [shape: bf16[64,576], index: 0, kind: input, shape index: {}]   ;;  %s1276_s3 = inlined_call_operand.vmem [shape: f32[64,2], index: 3, kind: output, shape index: {}]  }
   0x1   :  { %v909_v0 = vld [vmem:[%s1273_s1 + $0x38] sm:$0xff]  ;;  %v908_v1 = vld [vmem:[%s1273_s1 + $0x30] sm:$0xff]  ;;  %v907_v4 = vld [vmem:[%s1273_s1 + $0x28] sm:$0xff]  ;;  %956 = vset.pattern.permute.xlu1 %v958_v6  ;;  %955 = vset.pattern.permute.xlu0 %v958_v6 }
   0x2   :  { %938 = vmatpush.bf16.msra.mxu1 %v909_v0  ;;  %939 = vmatpush.bf16.msra.mxu2 %v909_v0  ;;  %v933_v2 = vld [vmem:[%s1273_s1 + $0xf8] sm:$0xff]  ;;  %v932_v3 = vld [vmem:[%s1273_s1 + $0xf0] sm:$0xff]  ;;  %v931_v5 = vld [vmem:[%s1273_s1 + $0xe8] sm:$0xff] }
   0x3   :  { %488 = vmatpush.bf16.msra.mxu0 %v909_v0  ;;  %575 = vmatpush.bf16.msra.mxu3 %v933_v2  ;;  %v906_v7 = vld [vmem:[%s1273_s1 + $0x20] sm:$0xff]  ;;  %v113_v8 = vld [vmem:[%s1274_s2 + $0x10] sm:$0xff]  ;;  %v905_v11 = vld [vmem:[%s1273_s1 + $0x18] sm:$0xff] }
   0x4   :  { %957 = vset.pattern.permute.xlu2 %v958_v6  ;;  %v930_v9 = vld [vmem:[%s1273_s1 + $0xe0] sm:$0xff]  ;;  %131 = vperm.xlu1 %956, %v113_v8   ;;  %v929_v12 = vld [vmem:[%s1273_s1 + $0xd8] sm:$0xff]  ;;  %v904_v13 = vld [vmem:[%s1273_s1 + $0x10] sm:$0xff] }
   0x5   :  { %v111_v10 = vld [vmem:[%s1274_s2] sm:$0xff]  ;;  %v114_v14 = vld [vmem:[%s1274_s2 + $0x18] sm:$0xff]  ;;  %v928_v15 = vld [vmem:[%s1273_s1 + $0xd0] sm:$0xff] }
   0x6   :  { %940 = vmatpush.bf16.msra.mxu1 %v908_v1  ;;  %941 = vmatpush.bf16.msra.mxu2 %v908_v1  ;;  %v112_v16 = vld [vmem:[%s1274_s2 + $0x8] sm:$0xff]  ;;  %v902_v19 = vld [vmem:[%s1273_s1] sm:$0xff]  ;;  %v889_v21 = vld [vmem:[%s1275_s0 + $0x38] sm:$0xf0] }
   0x7   :  { %489 = vmatpush.bf16.msra.mxu0 %v908_v1  ;;  %576 = vmatpush.bf16.msra.mxu3 %v932_v3  ;;  %v903_v17 = vld [vmem:[%s1273_s1 + $0x8] sm:$0xff]  ;;  %v716_v22 = vld [vmem:[%s1275_s0 + $0x78] sm:$0xf]  ;;  %v656_v26 = vld [vmem:[%s1275_s0] sm:$0xf] }
   0x8   :  { %121 = vperm.xlu0 %955, %v111_v10   ;;  %v927_v18 = vld [vmem:[%s1273_s1 + $0xc8] sm:$0xff]  ;;  %v925_v24 = vld [vmem:[%s1273_s1 + $0xb8] sm:$0xff]  ;;  %v926_v27 = vld [vmem:[%s1273_s1 + $0xc0] sm:$0xff] }
   0x9   :  { %v676_v20 = vld [vmem:[%s1275_s0 + $0x28] sm:$0xf]  ;;  %v899_v23 = vld [vmem:[%s1275_s0 + $0x88] sm:$0xf0]  ;;  %v917_v25 = vld [vmem:[%s1273_s1 + $0x78] sm:$0xff] }
   0xa   :  { %942 = vmatpush.bf16.msra.mxu1 %v907_v4  ;;  %943 = vmatpush.bf16.msra.mxu2 %v907_v4  ;;  %v677_v28 = vor.u32 %v889_v21, %v676_v20  ;;  %v717_v29 = vor.u32 %v899_v23, %v716_v22  ;;  %v884_v30 = vld [vmem:[%s1275_s0 + $0x10] sm:$0xf0]  ;;  %v883_v31 = vld [vmem:[%s1275_s0 + $0xc] sm:$0xf]  ;;  %v666_v32 = vld [vmem:[%s1275_s0 + $0x1c] sm:$0xf0] }
   0xb   :  { %490 = vmatpush.bf16.msra.mxu0 %v907_v4  ;;  %577 = vmatpush.bf16.msra.mxu3 %v931_v5  ;;  %v937_v33 = vld [vmem:[%s1273_s1 + $0x118] sm:$0xff]  ;;  %v924_v34 = vld [vmem:[%s1273_s1 + $0xb0] sm:$0xff]  ;;  %v657_v37 = vor.u32 %v884_v30, %v656_v26  ;;  %v669_v38 = vor.u32 %v883_v31, %v666_v32  ;;  %v923_v41 = vld [vmem:[%s1273_s1 + $0xa8] sm:$0xff] }
   0xc   :  { %136 = vperm.xlu1 %956, %v114_v14   ;;  %v916_v35 = vld [vmem:[%s1273_s1 + $0x70] sm:$0xff]  ;;  %v118_v36 = vld [vmem:[%s1274_s2 + $0x38] sm:$0xff]  ;;  %v915_v42 = vld [vmem:[%s1273_s1 + $0x68] sm:$0xff] }
   0xd   :  { %v936_v39 = vld [vmem:[%s1273_s1 + $0x110] sm:$0xff]  ;;  %v935_v43 = vld [vmem:[%s1273_s1 + $0x108] sm:$0xff]  ;;  %v922_v44 = vld [vmem:[%s1273_s1 + $0xa0] sm:$0xff] }
   0xe   :  { %944 = vmatpush.bf16.msra.mxu1 %v906_v7  ;;  %945 = vmatpush.bf16.msra.mxu2 %v906_v7  ;;  %v117_v40 = vld [vmem:[%s1274_s2 + $0x30] sm:$0xff]  ;;  %v914_v45 = vld [vmem:[%s1273_s1 + $0x60] sm:$0xff]  ;;  %v921_v49 = vld [vmem:[%s1273_s1 + $0x98] sm:$0xff] }
   0xf   :  { %491 = vmatpush.bf16.msra.mxu0 %v906_v7  ;;  %578 = vmatpush.bf16.msra.mxu3 %v930_v9  ;;  %v696_v46 = vld [vmem:[%s1275_s0 + $0x50] sm:$0xf]  ;;  %v894_v47 = vld [vmem:[%s1275_s0 + $0x60] sm:$0xf0]  ;;  %v913_v50 = vld [vmem:[%s1273_s1 + $0x58] sm:$0xff] }
  0x10   :  { %126 = vperm.xlu0 %955, %v112_v16   ;;  %v934_v48 = vld [vmem:[%s1273_s1 + $0x100] sm:$0xff]  ;;  %v672_v51 = vld [vmem:[%s1275_s0 + $0x10] sm:$0xf]  ;;  %v697_v52 = vor.u32 %v894_v47, %v696_v46  ;;  %v888_v54 = vld [vmem:[%s1275_s0 + $0x34] sm:$0xf] }
  0x11   :  { %v886_v53 = vld [vmem:[%s1275_s0 + $0x20] sm:$0xf0]  ;;  %v686_v55 = vld [vmem:[%s1275_s0 + $0x44] sm:$0xf0]  ;;  %v920_v56 = vld [vmem:[%s1273_s1 + $0x90] sm:$0xff] }
  0x12   :  { %946 = vmatpush.bf16.msra.mxu1 %v905_v11  ;;  %947 = vmatpush.bf16.msra.mxu2 %v905_v11  ;;  %v912_v57 = vld [vmem:[%s1273_s1 + $0x50] sm:$0xff]  ;;  %v673_v58 = vor.u32 %v886_v53, %v672_v51  ;;  %v689_v59 = vor.u32 %v888_v54, %v686_v55  ;;  %v115_v60 = vld [vmem:[%s1274_s2 + $0x20] sm:$0xff]  ;;  %v919_v61 = vld [vmem:[%s1273_s1 + $0x88] sm:$0xff] }
  0x13   :  { %492 = vmatpush.bf16.msra.mxu0 %v905_v11  ;;  %579 = vmatpush.bf16.msra.mxu3 %v929_v12  ;;  %v911_v62 = vld [vmem:[%s1273_s1 + $0x48] sm:$0xff]  ;;  %v918_v63 = vld [vmem:[%s1273_s1 + $0x80] sm:$0xff]  ;;  %v885_v2 = vld [vmem:[%s1275_s0 + $0x18] sm:$0xf0] }
  0x14   :  { %156 = vperm.xlu1 %956, %v118_v36   ;;  %141 = vperm.xlu2 %957, %v115_v60   ;;  %v910_v0 = vld [vmem:[%s1273_s1 + $0x40] sm:$0xff]  ;;  %v664_v1 = vld [vmem:[%s1275_s0 + $0x8] sm:$0xf]  ;;  %v658_v6 = vld [vmem:[%s1275_s0 + $0x14] sm:$0xf0] }
  0x15   :  { %v116_v3 = vld [vmem:[%s1274_s2 + $0x28] sm:$0xff]  ;;  %v665_v4 = vor.u32 %v885_v2, %v664_v1  ;;  %v882_v5 = vld [vmem:[%s1275_s0 + $0x4] sm:$0xf]  ;;  %v692_v7 = vld [vmem:[%s1275_s0 + $0x38] sm:$0xf] }
  0x16   :  { %948 = vmatpush.bf16.msra.mxu1 %v904_v13  ;;  %949 = vmatpush.bf16.msra.mxu2 %v904_v13  ;;  %v661_v8 = vor.u32 %v882_v5, %v658_v6  ;;  %v891_v9 = vld [vmem:[%s1275_s0 + $0x48] sm:$0xf0]  ;;  %v893_v10 = vld [vmem:[%s1275_s0 + $0x5c] sm:$0xf]  ;;  %v706_v11 = vld [vmem:[%s1275_s0 + $0x6c] sm:$0xf0] }
  0x17   :  { %493 = vmatpush.bf16.msra.mxu0 %v904_v13  ;;  %580 = vmatpush.bf16.msra.mxu3 %v928_v15  ;;  %v693_v12 = vor.u32 %v891_v9, %v692_v7  ;;  %v709_v13 = vor.u32 %v893_v10, %v706_v11  ;;  %v684_v14 = vld [vmem:[%s1275_s0 + $0x30] sm:$0xf]  ;;  %v890_v15 = vld [vmem:[%s1275_s0 + $0x40] sm:$0xf0]  ;;  %v896_v21 = vld [vmem:[%s1275_s0 + $0x70] sm:$0xf0] }
  0x18   :  { %151 = vperm.xlu0 %955, %v117_v40   ;;  %v685_v16 = vor.u32 %v890_v15, %v684_v14  ;;  %v898_v22 = vld [vmem:[%s1275_s0 + $0x84] sm:$0xf]  ;;  %v726_v23 = vld [vmem:[%s1275_s0 + $0x94] sm:$0xf0]  ;;  %v698_v30 = vld [vmem:[%s1275_s0 + $0x64] sm:$0xf0] }
  0x19   :  { %v704_v26 = vld [vmem:[%s1275_s0 + $0x58] sm:$0xf]  ;;  %v732_v32 = vld [vmem:[%s1275_s0 + $0x88] sm:$0xf]  ;;  %v900_v36 = vld [vmem:[%s1275_s0 + $0x90] sm:$0xf0] }
  0x1a   :  { %950 = vmatpush.bf16.msra.mxu1 %v903_v17  ;;  %951 = vmatpush.bf16.msra.mxu2 %v903_v17 }
  0x1b   :  { %494 = vmatpush.bf16.msra.mxu0 %v903_v17  ;;  %581 = vmatpush.bf16.msra.mxu3 %v927_v18  ;;  %v887_v17 = vld [vmem:[%s1275_s0 + $0x2c] sm:$0xf]  ;;  %v678_v18 = vld [vmem:[%s1275_s0 + $0x3c] sm:$0xf0] }
  0x1c   :  { %146 = vperm.xlu2 %957, %v116_v3   ;;  %v681_v20 = vor.u32 %v887_v17, %v678_v18 }
  0x1e   :  { %952 = vmatpush.bf16.msra.mxu1 %v902_v19  ;;  %953 = vmatpush.bf16.msra.mxu2 %v902_v19 }
  0x1f   :  { %495 = vmatpush.bf16.msra.mxu0 %v902_v19  ;;  %582 = vmatpush.bf16.msra.mxu3 %v926_v27  ;;  %v712_v19 = vld [vmem:[%s1275_s0 + $0x60] sm:$0xf]  ;;  %v895_v27 = vld [vmem:[%s1275_s0 + $0x68] sm:$0xf0] }
  0x21   :  { %501 = vmatmul.bf16.vlgmr.msra.gmra.mxu1 %v677_v28  ;;  %511 = vmatmul.bf16.vlgmr.msra.gmra.mxu2 %v717_v29  ;;  %v705_v28 = vor.u32 %v895_v27, %v704_v26  ;;  %v892_v29 = vld [vmem:[%s1275_s0 + $0x54] sm:$0xf] }
  0x22   :  { %546 = vmatpush.bf16.msrb.mxu2 %v925_v24  ;;  %517 = vmatpush.bf16.msrb.mxu1 %v917_v25  ;;  %v713_v24 = vor.u32 %v896_v21, %v712_v19  ;;  %v729_v25 = vor.u32 %v898_v22, %v726_v23  ;;  %v701_v31 = vor.u32 %v892_v29, %v698_v30 }
  0x23   :  { %608 = vmatpush.bf16.msrb.mxu0 %v937_v33  ;;  %583 = vmatmul.bf16.vlgmr.msra.gmra.mxu3 %v669_v38  ;;  %v901_v33 = vld [vmem:[%s1275_s0 + $0x98] sm:$0xf0] }
  0x24   :  { %496 = vmatmul.bf16.vlgmr.msra.gmra.mxu0 %v657_v37  ;;  %v897_v38 = vld [vmem:[%s1275_s0 + $0x7c] sm:$0xf] }
  0x26   :  { %547 = vmatpush.bf16.msrb.mxu2 %v924_v34  ;;  %518 = vmatpush.bf16.msrb.mxu1 %v916_v35  ;;  %v733_v34 = vor.u32 %v901_v33, %v732_v32  ;;  %v724_v35 = vld [vmem:[%s1275_s0 + $0x80] sm:$0xf] }
  0x27   :  { %609 = vmatpush.bf16.msrb.mxu0 %v936_v39  ;;  %v725_v37 = vor.u32 %v900_v36, %v724_v35  ;;  %v718_v39 = vld [vmem:[%s1275_s0 + $0x8c] sm:$0xf0] }
  0x28   :  { %v721_v40 = vor.u32 %v897_v38, %v718_v39 }
  0x2a   :  { %548 = vmatpush.bf16.msrb.mxu2 %v923_v41  ;;  %519 = vmatpush.bf16.msrb.mxu1 %v915_v42 }
  0x2b   :  { %610 = vmatpush.bf16.msrb.mxu0 %v935_v43 }
  0x2e   :  { %549 = vmatpush.bf16.msrb.mxu2 %v922_v44  ;;  %520 = vmatpush.bf16.msrb.mxu1 %v914_v45 }
  0x2f   :  { %611 = vmatpush.bf16.msrb.mxu0 %v934_v48 }
  0x31   :  { %506 = vmatmul.bf16.gmra.mxu1 %v697_v52 }
  0x32   :  { %550 = vmatpush.bf16.msrb.mxu2 %v921_v49  ;;  %521 = vmatpush.bf16.msrb.mxu1 %v913_v50 }
  0x33   :  { %588 = vmatmul.bf16.gmra.mxu3 %v689_v59 }
  0x34   :  { %878 = vmatmul.msk.bf16.vlgmr.msrb.gmra.mxu0 %vm475_vm0, %v673_v58 }
  0x36   :  { %551 = vmatpush.bf16.msrb.mxu2 %v920_v56  ;;  %522 = vmatpush.bf16.msrb.mxu1 %v912_v57 }
  0x3a   :  { %552 = vmatpush.bf16.msrb.mxu2 %v919_v61  ;;  %523 = vmatpush.bf16.msrb.mxu1 %v911_v62 }
  0x3e   :  { %553 = vmatpush.bf16.msrb.mxu2 %v918_v63  ;;  %524 = vmatpush.bf16.msrb.mxu1 %v910_v0 }
  0x41   :  { %554 = vmatmul.bf16.vlgmr.msrb.gmra.mxu2 %v665_v4  ;;  %525 = vmatmul.bf16.vlgmr.msrb.gmra.mxu1 %v661_v8 }
  0x43   :  { %593 = vmatmul.bf16.gmra.mxu3 %v709_v13 }
  0x44   :  { %879 = vmatmul.msk.bf16.gmra.mxu0 %vm475_vm0, %v693_v12 }
  0x51   :  { %559 = vmatmul.bf16.gmra.mxu2 %v685_v16  ;;  %530 = vmatmul.bf16.gmra.mxu1 %v681_v20 }
  0x53   :  { %598 = vmatmul.bf16.gmra.mxu3 %v729_v25 }
  0x54   :  { %880 = vmatmul.msk.bf16.gmra.mxu0 %vm475_vm0, %v713_v24 }
  0x61   :  { %564 = vmatmul.bf16.gmra.mxu2 %v705_v28  ;;  %535 = vmatmul.bf16.gmra.mxu1 %v701_v31 }
  0x64   :  { %881 = vmatmul.msk.bf16.gmra.mxu0 %vm475_vm0, %v733_v34 }
  0x6e   :  { %v142_v23 = vpop.permute.xlu2 %141 }
  0x71   :  { %569 = vmatmul.bf16.gmra.mxu2 %v725_v37  ;;  %540 = vmatmul.bf16.gmra.mxu1 %v721_v40 }
  0x76   :  { %v132_v1 = vpop.permute.xlu1 %131  ;;  %v147_v36 = vpop.permute.xlu2 %146 }
  0x7a   :  { %v122_v51 = vpop.permute.xlu0 %121 }
  0x7e   :  { %v137_v14 = vpop.permute.xlu1 %136 }
  0x82   :  { %v127_v59 = vpop.permute.xlu0 %126 }
  0x9e   :  { %v502_v41 = vpop.f32.mrf.mxu1 }
  0x9f   :  { %v503_v8 = vadd.f32 %v502_v41, %v132_v1 }
  0xa1   :  { %v497_v42 = vpop.f32.mrf.mxu0 }
  0xa2   :  { %v498_v52 = vadd.f32 %v497_v42, %v122_v51 }
  0xa4   :  { %v1235_v46 = vpop.f32.mrf.mxu2 }
  0xa6   :  { %v504_v43 = vpop.f32.mrf.mxu1  ;;  %v584_v47 = vpop.f32.mrf.mxu3 }
  0xa7   :  { %v505_v18 = vadd.f32 %v504_v43, %v137_v14 }
  0xa9   :  { %v499_v44 = vpop.f32.mrf.mxu0 }
  0xaa   :  { %v500_v61 = vadd.f32 %v499_v44, %v127_v59  ;;  %v157_v59 = vpop.permute.xlu1 %156 }
  0xac   :  { %v1237_v50 = vpop.f32.mrf.mxu2 }
  0xae   :  { %v507_v45 = vpop.f32.mrf.mxu1  ;;  %v586_v55 = vpop.f32.mrf.mxu3 }
  0xaf   :  { %v508_v28 = vadd.f32 %v507_v45, %v142_v23 }
  0xb1   :  { %v613_v49 = vpop.f32.mrf.mxu0 }
  0xb6   :  { %v509_v48 = vpop.f32.mrf.mxu1  ;;  %v589_v4 = vpop.f32.mrf.mxu3 }
  0xb7   :  { %v510_v39 = vadd.f32 %v509_v48, %v147_v36 }
  0xb9   :  { %v615_v57 = vpop.f32.mrf.mxu0 }
  0xbe   :  { %v526_v53 = vpop.f32.mrf.mxu1  ;;  %v591_v16 = vpop.f32.mrf.mxu3 }
  0xbf   :  { %v527_v54 = vadd.f32 %v526_v53, %v498_v52 }
  0xc1   :  { %v618_v6 = vpop.f32.mrf.mxu0 }
  0xc4   :  { %v555_v56 = vpop.f32.mrf.mxu2 }
  0xc5   :  { %v556_v58 = vadd.f32 %v555_v56, %v527_v54 }
  0xc6   :  { %v528_v63 = vpop.f32.mrf.mxu1  ;;  %v594_v29 = vpop.f32.mrf.mxu3 }
  0xc7   :  { %v585_v60 = vadd.f32 %v584_v47, %v556_v58  ;;  %v529_v0 = vadd.f32 %v528_v63, %v500_v61  ;;  %v515_v63 = vadd.f32 %v1237_v50, %v157_v59 }
  0xc9   :  { %v614_v62 = vadd.f32 %v613_v49, %v585_v60  ;;  %v620_v19 = vpop.f32.mrf.mxu0  ;;  %v152_v49 = vpop.permute.xlu0 %151 }
  0xca   :  { %v513_v53 = vadd.f32 %v1235_v46, %v152_v49 }
  0xcb   :  { %v633_v2 = vmax.f32 %v614_v62, 0.0 }
  0xcc   :  { %v557_v3 = vpop.f32.mrf.mxu2 }
  0xcd   :  { %642 = vst.msk [vmem:[%s1276_s3] sm:$0xff] %vm641_vm1, %v633_v2  ;;  %v558_v5 = vadd.f32 %v557_v3, %v529_v0 }
  0xce   :  { %v531_v10 = vpop.f32.mrf.mxu1  ;;  %v596_v42 = vpop.f32.mrf.mxu3 }
  0xcf   :  { %v587_v7 = vadd.f32 %v586_v55, %v558_v5  ;;  %v532_v11 = vadd.f32 %v531_v10, %v503_v8 }
  0xd1   :  { %v616_v9 = vadd.f32 %v615_v57, %v587_v7  ;;  %v623_v32 = vpop.f32.mrf.mxu0 }
  0xd3   :  { %v634_v12 = vmax.f32 %v616_v9, 0.0 }
  0xd4   :  { %v560_v13 = vpop.f32.mrf.mxu2 }
  0xd5   :  { %643 = vst.msk [vmem:[%s1276_s3 + $0x8] sm:$0xff] %vm641_vm1, %v634_v12  ;;  %v561_v15 = vadd.f32 %v560_v13, %v532_v11 }
  0xd6   :  { %v533_v21 = vpop.f32.mrf.mxu1  ;;  %v599_v57 = vpop.f32.mrf.mxu3 }
  0xd7   :  { %v590_v17 = vadd.f32 %v589_v4, %v561_v15  ;;  %v534_v22 = vadd.f32 %v533_v21, %v505_v18 }
  0xd9   :  { %v619_v20 = vadd.f32 %v618_v6, %v590_v17  ;;  %v625_v45 = vpop.f32.mrf.mxu0 }
  0xdb   :  { %v635_v24 = vmax.f32 %v619_v20, 0.0 }
  0xdc   :  { %v562_v25 = vpop.f32.mrf.mxu2 }
  0xdd   :  { %644 = vst.msk [vmem:[%s1276_s3 + $0x10] sm:$0xff] %vm641_vm1, %v635_v24  ;;  %v563_v26 = vadd.f32 %v562_v25, %v534_v22 }
  0xde   :  { %v536_v31 = vpop.f32.mrf.mxu1  ;;  %v601_v5 = vpop.f32.mrf.mxu3 }
  0xdf   :  { %v592_v27 = vadd.f32 %v591_v16, %v563_v26  ;;  %v537_v33 = vadd.f32 %v536_v31, %v508_v28 }
  0xe1   :  { %v621_v30 = vadd.f32 %v620_v19, %v592_v27  ;;  %v628_v61 = vpop.f32.mrf.mxu0 }
  0xe3   :  { %v636_v34 = vmax.f32 %v621_v30, 0.0 }
  0xe4   :  { %v565_v35 = vpop.f32.mrf.mxu2 }
  0xe5   :  { %645 = vst.msk [vmem:[%s1276_s3 + $0x18] sm:$0xff] %vm641_vm1, %v636_v34  ;;  %v566_v37 = vadd.f32 %v565_v35, %v537_v33 }
  0xe6   :  { %v538_v41 = vpop.f32.mrf.mxu1 }
  0xe7   :  { %v595_v38 = vadd.f32 %v594_v29, %v566_v37  ;;  %v539_v43 = vadd.f32 %v538_v41, %v510_v39 }
  0xe9   :  { %v624_v40 = vadd.f32 %v623_v32, %v595_v38  ;;  %v630_v7 = vpop.f32.mrf.mxu0 }
  0xeb   :  { %v637_v44 = vmax.f32 %v624_v40, 0.0 }
  0xec   :  { %v567_v47 = vpop.f32.mrf.mxu2 }
  0xed   :  { %646 = vst.msk [vmem:[%s1276_s3 + $0x20] sm:$0xff] %vm641_vm1, %v637_v44  ;;  %v568_v51 = vadd.f32 %v567_v47, %v539_v43 }
  0xee   :  { %v541_v55 = vpop.f32.mrf.mxu1 }
  0xef   :  { %v597_v52 = vadd.f32 %v596_v42, %v568_v51  ;;  %v542_v48 = vadd.f32 %v541_v55, %v513_v53 }
  0xf1   :  { %v626_v54 = vadd.f32 %v625_v45, %v597_v52 }
  0xf3   :  { %v638_v56 = vmax.f32 %v626_v54, 0.0 }
  0xf4   :  { %v570_v58 = vpop.f32.mrf.mxu2 }
  0xf5   :  { %647 = vst.msk [vmem:[%s1276_s3 + $0x28] sm:$0xff] %vm641_vm1, %v638_v56  ;;  %v571_v60 = vadd.f32 %v570_v58, %v542_v48 }
  0xf6   :  { %v543_v1 = vpop.f32.mrf.mxu1 }
  0xf7   :  { %v600_v62 = vadd.f32 %v599_v57, %v571_v60  ;;  %v544_v46 = vadd.f32 %v543_v1, %v515_v63 }
  0xf9   :  { %v629_v0 = vadd.f32 %v628_v61, %v600_v62 }
  0xfb   :  { %v639_v2 = vmax.f32 %v629_v0, 0.0 }
  0xfc   :  { %v572_v3 = vpop.f32.mrf.mxu2 }
  0xfd   :  { %648 = vst.msk [vmem:[%s1276_s3 + $0x30] sm:$0xff] %vm641_vm1, %v639_v2  ;;  %v573_v4 = vadd.f32 %v572_v3, %v544_v46 }
  0xff   :  { %v602_v6 = vadd.f32 %v601_v5, %v573_v4 }
 0x101   :  { %v631_v8 = vadd.f32 %v630_v7, %v602_v6 }
 0x103   :  { %v640_v9 = vmax.f32 %v631_v8, 0.0 }
 0x105   :  { %649 = vst.msk [vmem:[%s1276_s3 + $0x38] sm:$0xff] %vm641_vm1, %v640_v9 }

// kernel: target_rnd_forward.7
= control target key start
LH: loop header
LB: loop body
LE: loop exit
PB: predicated region body
PF: predicated region fallthrough
CT: control target
= control target key end

     0   :  { %v159_v1 = vmov 0   ;;  %vm85_vm0 = vcmask 523264   ;;  %vm111_vm1 = vcmask 15360   ;;  %s222_s1 = inlined_call_operand.vmem [shape: bf16[64,2], index: 1, kind: input, shape index: {}]   ;;  %s223_s2 = inlined_call_operand.vmem [shape: f32[32,1], index: 2, kind: input, shape index: {}]   ;;  %s224_s0 = inlined_call_operand.vmem [shape: bf16[32,64], index: 0, kind: input, shape index: {}]   ;;  %s225_s3 = inlined_call_operand.vmem [shape: f32[32,2], index: 3, kind: output, shape index: {}]  }
   0x1   :  { %v151_v0 = vld [vmem:[%s222_s1 + $0x18] sm:$0xff]  ;;  %158 = vset.pattern.permute.xlu1 %v159_v1  ;;  %157 = vset.pattern.permute.xlu0 %v159_v1  ;;  %v150_v2 = vld [vmem:[%s222_s1 + $0x10] sm:$0xff]  ;;  %v27_v4 = vld [vmem:[%s223_s2] sm:$0xff] }
   0x2   :  { %96 = vmatpush.bf16.msra.mxu0 %v151_v0  ;;  %152 = vmatpush.bf16.msra.mxu1 %v151_v0  ;;  %v29_v3 = vld [vmem:[%s223_s2 + $0x10] sm:$0xff]  ;;  %v149_v5 = vld [vmem:[%s222_s1 + $0x8] sm:$0xff]  ;;  %v30_v6 = vld [vmem:[%s223_s2 + $0x18] sm:$0xff] }
   0x3   :  { %43 = vperm.xlu1 %158, %v29_v3   ;;  %33 = vperm.xlu0 %157, %v27_v4   ;;  %v28_v7 = vld [vmem:[%s223_s2 + $0x8] sm:$0xff]  ;;  %v148_v8 = vld [vmem:[%s222_s1] sm:$0xff] }
   0x4   :  { %v146_v9 = vld [vmem:[%s224_s0] sm:$0xff]  ;;  %v147_v10 = vld [vmem:[%s224_s0 + $0x8] sm:$0xff] }
   0x6   :  { %97 = vmatpush.bf16.msra.mxu0 %v150_v2  ;;  %153 = vmatpush.bf16.msra.mxu1 %v150_v2 }
   0xa   :  { %98 = vmatpush.bf16.msra.mxu0 %v149_v5  ;;  %154 = vmatpush.bf16.msra.mxu1 %v149_v5 }
   0xb   :  { %48 = vperm.xlu1 %158, %v30_v6   ;;  %38 = vperm.xlu0 %157, %v28_v7  }
   0xe   :  { %99 = vmatpush.bf16.msra.mxu0 %v148_v8  ;;  %155 = vmatpush.bf16.msra.mxu1 %v148_v8 }
  0x11   :  { %144 = vmatmul.msk.bf16.vlgmr.msra.gmra.mxu0 %vm85_vm0, %v146_v9  ;;  %145 = vmatmul.msk.bf16.vlgmr.msra.gmra.mxu1 %vm85_vm0, %v147_v10 }
  0x75   :  { %v44_v11 = vpop.permute.xlu1 %43  ;;  %v34_v12 = vpop.permute.xlu0 %33 }
  0x7d   :  { %v49_v17 = vpop.permute.xlu1 %48  ;;  %v39_v18 = vpop.permute.xlu0 %38 }
  0x8e   :  { %v101_v13 = vpop.f32.mrf.mxu0  ;;  %v106_v14 = vpop.f32.mrf.mxu1 }
  0x8f   :  { %v102_v15 = vadd.f32 %v101_v13, %v34_v12  ;;  %v107_v16 = vadd.f32 %v106_v14, %v44_v11 }
  0x91   :  { %112 = vst.msk [vmem:[%s225_s3] sm:$0xff] %vm111_vm1, %v102_v15 }
  0x92   :  { %114 = vst.msk [vmem:[%s225_s3 + $0x10] sm:$0xff] %vm111_vm1, %v107_v16 }
  0x96   :  { %v103_v19 = vpop.f32.mrf.mxu0  ;;  %v108_v20 = vpop.f32.mrf.mxu1 }
  0x97   :  { %v104_v21 = vadd.f32 %v103_v19, %v39_v18  ;;  %v109_v22 = vadd.f32 %v108_v20, %v49_v17 }
  0x99   :  { %113 = vst.msk [vmem:[%s225_s3 + $0x8] sm:$0xff] %vm111_vm1, %v104_v21 }
  0x9a   :  { %115 = vst.msk [vmem:[%s225_s3 + $0x18] sm:$0xff] %vm111_vm1, %v109_v22 }

</bundles_post_ra>
